<compile_context>
chip_gen: v5e
topology: v5e:2x2
jax: 0.10.0
libtpu: 0.0.40
codegen_flags: <defaults>
</compile_context>

<pallas_src>
import functools

import jax
import jax.numpy as jnp
from jax import lax
from jax.experimental import pallas as pl
from jax.experimental.pallas import tpu as pltpu

block_size = 256
n_embd = 192
HEAD_PAD = 64   # pad per-head width up to a multiple of this (lane-friendly)


# ----------------------------------------------------------------------------
# Fused kernel: grid = (batch, query-tile).
# ----------------------------------------------------------------------------
def fused_mha_kernel(x_ref, wqkv_ref, wp_ref, bp_ref, o_ref, qkv_scr, *,
                     num_heads, head_pad, q_tile):
    nh, Hp, Tq = num_heads, head_pad, q_tile
    T = x_ref.shape[1]
    qi = pl.program_id(1)

    # Fused QKV projection once per batch element; result (bf16) stays resident
    # in VMEM scratch for every query tile of this batch element.
    @pl.when(qi == 0)
    def _():
        qkv = jnp.dot(x_ref[0], wqkv_ref[...],
                      preferred_element_type=jnp.float32)       # (T, 3*nh*Hp)
        qkv_scr[...] = qkv.astype(jnp.bfloat16)

    row0 = qi * Tq

    # Causal mask for this query tile via broadcast-compared iotas
    # (no (T,T) int32 tensors).
    qidx = lax.broadcasted_iota(jnp.int32, (Tq, 1), 0) + row0
    kidx = lax.broadcasted_iota(jnp.int32, (1, T), 1)
    causal = kidx <= qidx                                        # (Tq, T)

    head_outs = []
    for h in range(nh):
        q = qkv_scr[pl.ds(pl.multiple_of(row0, Tq), Tq),
                    h * Hp:(h + 1) * Hp]                         # (Tq, Hp) bf16
        k = qkv_scr[:, (nh + h) * Hp:(nh + h + 1) * Hp]          # (T,  Hp) bf16
        v = qkv_scr[:, (2 * nh + h) * Hp:(2 * nh + h + 1) * Hp]  # (T,  Hp) bf16

        # q @ k^T without materializing a transpose (contract last dims, MXU).
        s = lax.dot_general(q, k,
                            dimension_numbers=(((1,), (1,)), ((), ())),
                            preferred_element_type=jnp.float32)  # (Tq, T)

        # Safe because the causal diagonal guarantees >=1 unmasked entry per row.
        s = jnp.where(causal, s, -jnp.inf)
        s = s - jnp.max(s, axis=-1, keepdims=True)
        p = jnp.exp(s)                                           # f32
        l = jnp.sum(p, axis=-1, keepdims=True)                   # (Tq, 1)

        o_h = jnp.dot(p.astype(jnp.bfloat16), v,
                      preferred_element_type=jnp.float32)        # (Tq, Hp)
        # Normalize AFTER the PV matmul: Tq*Hp muls instead of Tq*T.
        head_outs.append(o_h * pl.reciprocal(l, approx=True))

    cat = jnp.concatenate(head_outs, axis=-1).astype(jnp.bfloat16)  # (Tq, nh*Hp)

    # Output projection + bias, lane-dense (Tq, C) slab per grid step.
    out = jnp.dot(cat, wp_ref[...], preferred_element_type=jnp.float32) + bp_ref[...]
    o_ref[0] = out.astype(o_ref.dtype)


# ----------------------------------------------------------------------------
# Host-side glue
# ----------------------------------------------------------------------------
def pack_weights(params, head_pad):
    """Pack q/k/v weights into one (C, 3*nh*Hp) bf16 matrix (1/sqrt(H) folded
    into Wq) and pad Wp rows to match; per-head blocks zero-padded H -> Hp."""
    wq, wk, wv = params["wq"], params["wk"], params["wv"]
    nh, C, H = wq.shape
    Hp = head_pad
    scale = H ** -0.5

    def cols(w):                           # (nh, C, H) -> (C, nh*Hp), zero-padded
        w = jnp.pad(w, ((0, 0), (0, 0), (0, Hp - H)))
        return jnp.transpose(w, (1, 0, 2)).reshape(C, nh * Hp)

    wqkv = jnp.concatenate([cols(wq * scale), cols(wk), cols(wv)], axis=1)
    wp = jnp.pad(params["wp"].reshape(nh, H, C), ((0, 0), (0, Hp - H), (0, 0)))
    wp = wp.reshape(nh * Hp, C)
    return wqkv.astype(jnp.bfloat16), wp.astype(jnp.bfloat16)


@jax.jit
def masked_multi_head_attention(x, params):
    B, T, C = x.shape
    nh, _, H = params["wq"].shape
    Hp = -(-H // HEAD_PAD) * HEAD_PAD              # e.g. 48 -> 64

    wqkv, wp = pack_weights(params, Hp)            # bf16, constant-folded under jit
    bp = params["bp"].astype(jnp.float32)
    x_bf = x.astype(jnp.bfloat16)                  # halves input DMA

    # Flash-style query tiling (pipeline depth / megacore balance).
    if T % 128 == 0:
        Tq = 128
    elif T % 64 == 0:
        Tq = 64
    else:
        Tq = T
    nq = T // Tq

    kernel = functools.partial(fused_mha_kernel,
                               num_heads=nh, head_pad=Hp, q_tile=Tq)
    return pl.pallas_call(
        kernel,
        out_shape=jax.ShapeDtypeStruct((B, T, C), jnp.float32),
        grid_spec=pltpu.PrefetchScalarGridSpec(
            num_scalar_prefetch=0,
            grid=(B, nq),
            in_specs=[
                # x: constant in qi -> DMA'd once per batch element.
                pl.BlockSpec((1, T, C), lambda b, qi: (b, 0, 0)),
                # weights: constant index maps -> DMA'd once, VMEM-resident.
                pl.BlockSpec((C, 3 * nh * Hp), lambda b, qi: (0, 0)),
                pl.BlockSpec((nh * Hp, C), lambda b, qi: (0, 0)),
                pl.BlockSpec((1, C), lambda b, qi: (0, 0)),
            ],
            out_specs=pl.BlockSpec((1, Tq, C), lambda b, qi: (b, qi, 0)),
            scratch_shapes=[pltpu.VMEM((T, 3 * nh * Hp), jnp.bfloat16)],
        ),
        compiler_params=pltpu.CompilerParams(
            dimension_semantics=("parallel", "arbitrary")),
    )(x_bf, wqkv, wp, bp)  # dropout(eval) = identity


# ----------------------------------------------------------------------------
# Params + pure-JAX reference
# ----------------------------------------------------------------------------
def init_params(key, num_heads, head_size):
    k1, k2, k3, k4, k5 = jax.random.split(key, 5)
    scale_in = n_embd ** -0.5
    scale_proj = (num_heads * head_size) ** -0.5
    # per-head Linear weights are (head_size, n_embd) in torch; stored transposed (C, H)
    wq = jax.random.uniform(k1, (num_heads, n_embd, head_size),
                            minval=-scale_in, maxval=scale_in, dtype=jnp.float32)
    wk = jax.random.uniform(k2, (num_heads, n_embd, head_size),
                            minval=-scale_in, maxval=scale_in, dtype=jnp.float32)
    wv = jax.random.uniform(k3, (num_heads, n_embd, head_size),
                            minval=-scale_in, maxval=scale_in, dtype=jnp.float32)
    # proj Linear(head_size*num_heads, n_embd): weight (n_embd, nh*H) stored transposed
    wp = jax.random.uniform(k4, (num_heads * head_size, n_embd),
                            minval=-scale_proj, maxval=scale_proj, dtype=jnp.float32)
    bp = jax.random.uniform(k5, (1, n_embd),
                            minval=-scale_proj, maxval=scale_proj, dtype=jnp.float32)
    return {"wq": wq, "wk": wk, "wv": wv, "wp": wp, "bp": bp}


def reference_forward(x, params):
    """Pure-JAX f32 reference for correctness check (eval-mode dropout)."""
    B, T, C = x.shape
    wq, wk, wv = params["wq"], params["wk"], params["wv"]
    q = jnp.einsum("btc,hcd->bhtd", x, wq)
    k = jnp.einsum("btc,hcd->bhtd", x, wk)
    v = jnp.einsum("btc,hcd->bhtd", x, wv)
    H = q.shape[-1]
    wei = jnp.einsum("bhtd,bhsd->bhts", q, k) * H ** -0.5
    mask = jnp.tril(jnp.ones((T, T), dtype=bool))
    wei = jnp.where(mask[None, None], wei, -jnp.inf)
    wei = jax.nn.softmax(wei, axis=-1)
    out = jnp.einsum("bhts,bhsd->bhtd", wei, v)
    cat = jnp.transpose(out, (0, 2, 1, 3)).reshape(B, T, -1)
    return cat @ params["wp"] + params["bp"]


if __name__ == "__main__":
    num_heads = 4
    head_size = 48           # num_heads * head_size == n_embd == 192
    B, T = 2, 8              # T <= block_size

    key = jax.random.PRNGKey(0)
    kx, kp = jax.random.split(key)
    x = jax.random.normal(kx, (B, T, n_embd), dtype=jnp.float32)
    params = init_params(kp, num_heads, head_size)

    out = masked_multi_head_attention(x, params)
    out = jax.block_until_ready(out)

    ref = reference_forward(x, params)
    assert out.shape == (B, T, n_embd)
    # bf16 MXU operands + approx reciprocal -> compare vs f32 reference with a
    # correspondingly relaxed tolerance.
    assert jnp.allclose(out, ref, atol=2e-2, rtol=2e-2), "mismatch vs JAX reference"

    print("KERNEL_OK")
</pallas_src>

<mosaic_0001>
module attributes {stable_mosaic.version = 11 : i64} {
  func.func @fused_mha_kernel(%arg0: i32, %arg1: i32, %arg2: memref<1x8x192xbf16, #tpu.memory_space<vmem>>, %arg3: memref<192x768xbf16, #tpu.memory_space<vmem>>, %arg4: memref<256x192xbf16, #tpu.memory_space<vmem>>, %arg5: memref<1x192xf32, #tpu.memory_space<vmem>>, %arg6: memref<1x8x192xf32, #tpu.memory_space<vmem>>, %arg7: memref<8x768xbf16, #tpu.memory_space<vmem>>) attributes {dimension_semantics = [#tpu.dimension_semantics<parallel>, #tpu.dimension_semantics<arbitrary>], iteration_bounds = array<i64: 2, 1>, scalar_prefetch = 0 : i64, scratch_operands = 1 : i64, tpu.core_type = #tpu.core_type<tc>, window_params = [{transform_indices = @transform_0, window_bounds = array<i64: 1, 8, 192>}, {pipeline_mode = #tpu.pipeline_mode<synchronous>, transform_indices = @transform_1, window_bounds = array<i64: 192, 768>}, {pipeline_mode = #tpu.pipeline_mode<synchronous>, transform_indices = @transform_2, window_bounds = array<i64: 256, 192>}, {pipeline_mode = #tpu.pipeline_mode<synchronous>, transform_indices = @transform_3, window_bounds = array<i64: 1, 192>}, {transform_indices = @transform_4, window_bounds = array<i64: 1, 8, 192>}]} {
    %c0_i32 = arith.constant 0 : i32
    %0 = arith.cmpi eq, %arg1, %c0_i32 : i32
    %1 = arith.extui %0 : i1 to i32
    %c0_i32_0 = arith.constant 0 : i32
    %2 = arith.cmpi ne, %1, %c0_i32_0 : i32
    scf.if %2 {
      %c0_36 = arith.constant 0 : index
      %c0_37 = arith.constant 0 : index
      %c0_38 = arith.constant 0 : index
      %101 = vector.load %arg2[%c0_36, %c0_37, %c0_38] : memref<1x8x192xbf16, #tpu.memory_space<vmem>>, vector<1x8x192xbf16>
      %102 = vector.shape_cast %101 : vector<1x8x192xbf16> to vector<8x192xbf16>
      %c0_39 = arith.constant 0 : index
      %c0_40 = arith.constant 0 : index
      %103 = vector.load %arg3[%c0_39, %c0_40] : memref<192x768xbf16, #tpu.memory_space<vmem>>, vector<192x768xbf16>
      %cst_41 = arith.constant dense<0.000000e+00> : vector<8x768xf32>
      %104 = tpu.matmul %102, %103, %cst_41 {dimension_numbers = #tpu.dot_dimension_numbers<[1], [0], [0], [1], [0, 0, 1, 1], [], []>} : vector<8x192xbf16>, vector<192x768xbf16>, vector<8x768xf32> -> vector<8x768xf32>
      %105 = arith.truncf %104 : vector<8x768xf32> to vector<8x768xbf16>
      %c0_42 = arith.constant 0 : index
      %c0_43 = arith.constant 0 : index
      %106 = vector.load %arg7[%c0_42, %c0_43] : memref<8x768xbf16, #tpu.memory_space<vmem>>, vector<8x768xbf16>
      tpu.vector_store %arg7[%c0_42, %c0_43], %105 {strides = array<i32>} : memref<8x768xbf16, #tpu.memory_space<vmem>>, vector<8x768xbf16>,
    } else {
    }
    %c8_i32 = arith.constant 8 : i32
    %3 = arith.muli %arg1, %c8_i32 : i32
    %4 = tpu.iota {dimensions = array<i32: 0>} : vector<8x1xi32>
    %5 = vector.broadcast %3 : i32 to vector<8x1xi32>
    %6 = arith.addi %4, %5 : vector<8x1xi32>
    %7 = tpu.iota {dimensions = array<i32: 1>} : vector<1x8xi32>
    %8 = vector.broadcast %7 : vector<1x8xi32> to vector<8x8xi32>
    %9 = vector.broadcast %6 : vector<8x1xi32> to vector<8x8xi32>
    %10 = arith.cmpi sle, %8, %9 : vector<8x8xi32>
    %11 = tpu.assume_multiple %3, 8 : i32
    %12 = arith.index_cast %11 : i32 to index
    %c0 = arith.constant 0 : index
    %13 = vector.load %arg7[%12, %c0] : memref<8x768xbf16, #tpu.memory_space<vmem>>, vector<8x64xbf16>
    %c0_1 = arith.constant 0 : index
    %c256 = arith.constant 256 : index
    %14 = vector.load %arg7[%c0_1, %c256] : memref<8x768xbf16, #tpu.memory_space<vmem>>, vector<8x64xbf16>
    %c0_2 = arith.constant 0 : index
    %c512 = arith.constant 512 : index
    %15 = vector.load %arg7[%c0_2, %c512] : memref<8x768xbf16, #tpu.memory_space<vmem>>, vector<8x64xbf16>
    %cst = arith.constant dense<0.000000e+00> : vector<8x8xf32>
    %16 = tpu.matmul %13, %14, %cst {dimension_numbers = #tpu.dot_dimension_numbers<[1], [1], [0], [0], [0, 0, 1, 0], [], []>} : vector<8x64xbf16>, vector<8x64xbf16>, vector<8x8xf32> -> vector<8x8xf32>
    %cst_3 = arith.constant 0xFF800000 : f32
    %17 = vector.broadcast %cst_3 : f32 to vector<8x8xf32>
    %18 = arith.select %10, %16, %17 : vector<8x8xi1>, vector<8x8xf32>
    %cst_4 = arith.constant dense<0xFF800000> : vector<8xf32>
    %19 = vector.multi_reduction <maximumf>, %18, %cst_4 [1] : vector<8x8xf32> to vector<8xf32>
    %20 = vector.shape_cast %19 : vector<8xf32> to vector<8x1xf32>
    %21 = vector.broadcast %20 : vector<8x1xf32> to vector<8x8xf32>
    %22 = arith.subf %18, %21 : vector<8x8xf32>
    %23 = math.exp %22 : vector<8x8xf32>
    %cst_5 = arith.constant dense<0.000000e+00> : vector<8xf32>
    %24 = vector.multi_reduction <add>, %23, %cst_5 [1] : vector<8x8xf32> to vector<8xf32>
    %25 = vector.shape_cast %24 : vector<8xf32> to vector<8x1xf32>
    %26 = arith.truncf %23 : vector<8x8xf32> to vector<8x8xbf16>
    %cst_6 = arith.constant dense<0.000000e+00> : vector<8x64xf32>
    %27 = tpu.matmul %26, %15, %cst_6 {dimension_numbers = #tpu.dot_dimension_numbers<[1], [0], [0], [1], [0, 0, 1, 1], [], []>} : vector<8x8xbf16>, vector<8x64xbf16>, vector<8x64xf32> -> vector<8x64xf32>
    %28 = tpu.reciprocal %25 {approx = true} : vector<8x1xf32> -> vector<8x1xf32>
    %29 = vector.broadcast %28 : vector<8x1xf32> to vector<8x64xf32>
    %30 = arith.mulf %27, %29 : vector<8x64xf32>
    %31 = tpu.assume_multiple %3, 8 : i32
    %32 = arith.index_cast %31 : i32 to index
    %c64 = arith.constant 64 : index
    %33 = vector.load %arg7[%32, %c64] : memref<8x768xbf16, #tpu.memory_space<vmem>>, vector<8x64xbf16>
    %c0_7 = arith.constant 0 : index
    %c320 = arith.constant 320 : index
    %34 = vector.load %arg7[%c0_7, %c320] : memref<8x768xbf16, #tpu.memory_space<vmem>>, vector<8x64xbf16>
    %c0_8 = arith.constant 0 : index
    %c576 = arith.constant 576 : index
    %35 = vector.load %arg7[%c0_8, %c576] : memref<8x768xbf16, #tpu.memory_space<vmem>>, vector<8x64xbf16>
    %cst_9 = arith.constant dense<0.000000e+00> : vector<8x8xf32>
    %36 = tpu.matmul %33, %34, %cst_9 {dimension_numbers = #tpu.dot_dimension_numbers<[1], [1], [0], [0], [0, 0, 1, 0], [], []>} : vector<8x64xbf16>, vector<8x64xbf16>, vector<8x8xf32> -> vector<8x8xf32>
    %cst_10 = arith.constant 0xFF800000 : f32
    %37 = vector.broadcast %cst_10 : f32 to vector<8x8xf32>
    %38 = arith.select %10, %36, %37 : vector<8x8xi1>, vector<8x8xf32>
    %cst_11 = arith.constant dense<0xFF800000> : vector<8xf32>
    %39 = vector.multi_reduction <maximumf>, %38, %cst_11 [1] : vector<8x8xf32> to vector<8xf32>
    %40 = vector.shape_cast %39 : vector<8xf32> to vector<8x1xf32>
    %41 = vector.broadcast %40 : vector<8x1xf32> to vector<8x8xf32>
    %42 = arith.subf %38, %41 : vector<8x8xf32>
    %43 = math.exp %42 : vector<8x8xf32>
    %cst_12 = arith.constant dense<0.000000e+00> : vector<8xf32>
    %44 = vector.multi_reduction <add>, %43, %cst_12 [1] : vector<8x8xf32> to vector<8xf32>
    %45 = vector.shape_cast %44 : vector<8xf32> to vector<8x1xf32>
    %46 = arith.truncf %43 : vector<8x8xf32> to vector<8x8xbf16>
    %cst_13 = arith.constant dense<0.000000e+00> : vector<8x64xf32>
    %47 = tpu.matmul %46, %35, %cst_13 {dimension_numbers = #tpu.dot_dimension_numbers<[1], [0], [0], [1], [0, 0, 1, 1], [], []>} : vector<8x8xbf16>, vector<8x64xbf16>, vector<8x64xf32> -> vector<8x64xf32>
    %48 = tpu.reciprocal %45 {approx = true} : vector<8x1xf32> -> vector<8x1xf32>
    %49 = vector.broadcast %48 : vector<8x1xf32> to vector<8x64xf32>
    %50 = arith.mulf %47, %49 : vector<8x64xf32>
    %51 = tpu.assume_multiple %3, 8 : i32
    %52 = arith.index_cast %51 : i32 to index
    %c128 = arith.constant 128 : index
    %53 = vector.load %arg7[%52, %c128] : memref<8x768xbf16, #tpu.memory_space<vmem>>, vector<8x64xbf16>
    %c0_14 = arith.constant 0 : index
    %c384 = arith.constant 384 : index
    %54 = vector.load %arg7[%c0_14, %c384] : memref<8x768xbf16, #tpu.memory_space<vmem>>, vector<8x64xbf16>
    %c0_15 = arith.constant 0 : index
    %c640 = arith.constant 640 : index
    %55 = vector.load %arg7[%c0_15, %c640] : memref<8x768xbf16, #tpu.memory_space<vmem>>, vector<8x64xbf16>
    %cst_16 = arith.constant dense<0.000000e+00> : vector<8x8xf32>
    %56 = tpu.matmul %53, %54, %cst_16 {dimension_numbers = #tpu.dot_dimension_numbers<[1], [1], [0], [0], [0, 0, 1, 0], [], []>} : vector<8x64xbf16>, vector<8x64xbf16>, vector<8x8xf32> -> vector<8x8xf32>
    %cst_17 = arith.constant 0xFF800000 : f32
    %57 = vector.broadcast %cst_17 : f32 to vector<8x8xf32>
    %58 = arith.select %10, %56, %57 : vector<8x8xi1>, vector<8x8xf32>
    %cst_18 = arith.constant dense<0xFF800000> : vector<8xf32>
    %59 = vector.multi_reduction <maximumf>, %58, %cst_18 [1] : vector<8x8xf32> to vector<8xf32>
    %60 = vector.shape_cast %59 : vector<8xf32> to vector<8x1xf32>
    %61 = vector.broadcast %60 : vector<8x1xf32> to vector<8x8xf32>
    %62 = arith.subf %58, %61 : vector<8x8xf32>
    %63 = math.exp %62 : vector<8x8xf32>
    %cst_19 = arith.constant dense<0.000000e+00> : vector<8xf32>
    %64 = vector.multi_reduction <add>, %63, %cst_19 [1] : vector<8x8xf32> to vector<8xf32>
    %65 = vector.shape_cast %64 : vector<8xf32> to vector<8x1xf32>
    %66 = arith.truncf %63 : vector<8x8xf32> to vector<8x8xbf16>
    %cst_20 = arith.constant dense<0.000000e+00> : vector<8x64xf32>
    %67 = tpu.matmul %66, %55, %cst_20 {dimension_numbers = #tpu.dot_dimension_numbers<[1], [0], [0], [1], [0, 0, 1, 1], [], []>} : vector<8x8xbf16>, vector<8x64xbf16>, vector<8x64xf32> -> vector<8x64xf32>
    %68 = tpu.reciprocal %65 {approx = true} : vector<8x1xf32> -> vector<8x1xf32>
    %69 = vector.broadcast %68 : vector<8x1xf32> to vector<8x64xf32>
    %70 = arith.mulf %67, %69 : vector<8x64xf32>
    %71 = tpu.assume_multiple %3, 8 : i32
    %72 = arith.index_cast %71 : i32 to index
    %c192 = arith.constant 192 : index
    %73 = vector.load %arg7[%72, %c192] : memref<8x768xbf16, #tpu.memory_space<vmem>>, vector<8x64xbf16>
    %c0_21 = arith.constant 0 : index
    %c448 = arith.constant 448 : index
    %74 = vector.load %arg7[%c0_21, %c448] : memref<8x768xbf16, #tpu.memory_space<vmem>>, vector<8x64xbf16>
    %c0_22 = arith.constant 0 : index
    %c704 = arith.constant 704 : index
    %75 = vector.load %arg7[%c0_22, %c704] : memref<8x768xbf16, #tpu.memory_space<vmem>>, vector<8x64xbf16>
    %cst_23 = arith.constant dense<0.000000e+00> : vector<8x8xf32>
    %76 = tpu.matmul %73, %74, %cst_23 {dimension_numbers = #tpu.dot_dimension_numbers<[1], [1], [0], [0], [0, 0, 1, 0], [], []>} : vector<8x64xbf16>, vector<8x64xbf16>, vector<8x8xf32> -> vector<8x8xf32>
    %cst_24 = arith.constant 0xFF800000 : f32
    %77 = vector.broadcast %cst_24 : f32 to vector<8x8xf32>
    %78 = arith.select %10, %76, %77 : vector<8x8xi1>, vector<8x8xf32>
    %cst_25 = arith.constant dense<0xFF800000> : vector<8xf32>
    %79 = vector.multi_reduction <maximumf>, %78, %cst_25 [1] : vector<8x8xf32> to vector<8xf32>
    %80 = vector.shape_cast %79 : vector<8xf32> to vector<8x1xf32>
    %81 = vector.broadcast %80 : vector<8x1xf32> to vector<8x8xf32>
    %82 = arith.subf %78, %81 : vector<8x8xf32>
    %83 = math.exp %82 : vector<8x8xf32>
    %cst_26 = arith.constant dense<0.000000e+00> : vector<8xf32>
    %84 = vector.multi_reduction <add>, %83, %cst_26 [1] : vector<8x8xf32> to vector<8xf32>
    %85 = vector.shape_cast %84 : vector<8xf32> to vector<8x1xf32>
    %86 = arith.truncf %83 : vector<8x8xf32> to vector<8x8xbf16>
    %cst_27 = arith.constant dense<0.000000e+00> : vector<8x64xf32>
    %87 = tpu.matmul %86, %75, %cst_27 {dimension_numbers = #tpu.dot_dimension_numbers<[1], [0], [0], [1], [0, 0, 1, 1], [], []>} : vector<8x8xbf16>, vector<8x64xbf16>, vector<8x64xf32> -> vector<8x64xf32>
    %88 = tpu.reciprocal %85 {approx = true} : vector<8x1xf32> -> vector<8x1xf32>
    %89 = vector.broadcast %88 : vector<8x1xf32> to vector<8x64xf32>
    %90 = arith.mulf %87, %89 : vector<8x64xf32>
    %91 = tpu.concatenate %30, %50, %70, %90 in 1 : vector<8x64xf32>, vector<8x64xf32>, vector<8x64xf32>, vector<8x64xf32> -> vector<8x256xf32>
    %92 = arith.truncf %91 : vector<8x256xf32> to vector<8x256xbf16>
    %c0_28 = arith.constant 0 : index
    %c0_29 = arith.constant 0 : index
    %93 = vector.load %arg4[%c0_28, %c0_29] : memref<256x192xbf16, #tpu.memory_space<vmem>>, vector<256x192xbf16>
    %cst_30 = arith.constant dense<0.000000e+00> : vector<8x192xf32>
    %94 = tpu.matmul %92, %93, %cst_30 {dimension_numbers = #tpu.dot_dimension_numbers<[1], [0], [0], [1], [0, 0, 1, 1], [], []>} : vector<8x256xbf16>, vector<256x192xbf16>, vector<8x192xf32> -> vector<8x192xf32>
    %c0_31 = arith.constant 0 : index
    %c0_32 = arith.constant 0 : index
    %95 = vector.load %arg5[%c0_31, %c0_32] : memref<1x192xf32, #tpu.memory_space<vmem>>, vector<1x192xf32>
    %96 = vector.broadcast %95 : vector<1x192xf32> to vector<8x192xf32>
    %97 = arith.addf %94, %96 : vector<8x192xf32>
    %c0_33 = arith.constant 0 : index
    %c0_34 = arith.constant 0 : index
    %c0_35 = arith.constant 0 : index
    %98 = vector.load %arg6[%c0_33, %c0_34, %c0_35] : memref<1x8x192xf32, #tpu.memory_space<vmem>>, vector<1x8x192xf32>
    %99 = vector.shape_cast %98 : vector<1x8x192xf32> to vector<8x192xf32>
    %100 = vector.shape_cast %97 : vector<8x192xf32> to vector<1x8x192xf32>
    tpu.vector_store %arg6[%c0_33, %c0_34, %c0_35], %100 {strides = array<i32>} : memref<1x8x192xf32, #tpu.memory_space<vmem>>, vector<1x8x192xf32>,
    return
  }
  func.func @transform_0(%arg0: i32, %arg1: i32) -> (i32, i32, i32) {
    %c0_i32 = arith.constant 0 : i32
    %c0_i32_0 = arith.constant 0 : i32
    %c0_i32_1 = arith.constant 0 : i32
    return %arg0, %c0_i32, %c0_i32_0 : i32, i32, i32
  }
  func.func @transform_1(%arg0: i32, %arg1: i32) -> (i32, i32) {
    %c0_i32 = arith.constant 0 : i32
    %c0_i32_0 = arith.constant 0 : i32
    %c0_i32_1 = arith.constant 0 : i32
    return %c0_i32, %c0_i32_0 : i32, i32
  }
  func.func @transform_2(%arg0: i32, %arg1: i32) -> (i32, i32) {
    %c0_i32 = arith.constant 0 : i32
    %c0_i32_0 = arith.constant 0 : i32
    %c0_i32_1 = arith.constant 0 : i32
    return %c0_i32, %c0_i32_0 : i32, i32
  }
  func.func @transform_3(%arg0: i32, %arg1: i32) -> (i32, i32) {
    %c0_i32 = arith.constant 0 : i32
    %c0_i32_0 = arith.constant 0 : i32
    %c0_i32_1 = arith.constant 0 : i32
    return %c0_i32, %c0_i32_0 : i32, i32
  }
  func.func @transform_4(%arg0: i32, %arg1: i32) -> (i32, i32, i32) {
    %c0_i32 = arith.constant 0 : i32
    %c0_i32_0 = arith.constant 0 : i32
    return %arg0, %arg1, %c0_i32 : i32, i32, i32
  }
}

</mosaic_0001>

<bundles_post_ra>
// kernel: masked_multi_head_attention.1
= control target key start
LH: loop header
LB: loop body
LE: loop exit
PB: predicated region body
PF: predicated region fallthrough
CT: control target
= control target key end

     0   :  { %9 = vsyncpa [#allocation4], 0  ;;  %s2950_s0 = inlined_call_operand.vmem [shape: bf16[2,8,192], index: 0, kind: input, shape index: {}]   ;;  %s2951_s1 = inlined_call_operand.vmem [shape: bf16[192,768], index: 1, kind: input, shape index: {}]   ;;  %s2952_s2 = inlined_call_operand.vmem [shape: bf16[256,192], index: 2, kind: input, shape index: {}]   ;;  %s2953_s3 = inlined_call_operand.vmem [shape: f32[1,192], index: 3, kind: input, shape index: {}]   ;;  %s2954_s4 = inlined_call_operand.hbm [shape: f32[2,8,192], index: 4, kind: output, shape index: {}]  }
   0x1   :  { %11 = vsyncpa [#allocation4 + $0x1], 0  ;;  %s2163_s15 = smov 0   ;;  %s2165_s16 = smov 0  }
   0x2   :  { %s2167_s17 = smov 0   ;;  %s2169_s18 = smov 0  }
   0x3   :  { %s2171_s19 = smov 0   ;;  %s2173_s20 = smov 0  }
   0x4 LB: > { %s1431_s21 = sadd.s32 4294967295, %s2135_s20   ;;  %s1432_s22 = sadd.s32 4294967294, %s2135_s20   ;;  %s2135_s20 = sphi %s2173_s20, %s17_s20   ;;  %s2131_s19 = sphi %s2171_s19, %s2961_s19   ;;  %s2127_s18 = sphi %s2169_s18, %s2960_s18   ;;  %s2123_s17 = sphi %s2167_s17, %s2959_s17   ;;  %s2119_s16 = sphi %s2165_s16, %s2958_s16   ;;  %s2115_s15 = sphi %s2163_s15, %s2957_s15  }
   0x5   : > { %s29_s23 = sadd.s32 1, %s2131_s19  ;;  %s127_s24 = sadd.s32 1, %s2123_s17 }
   0x6   : > { %p31_p0 = scmp.ge.s32.totalorder %s29_s23, 2  ;;  %p137_p1 = scmp.ne.s32.totalorder %s2123_s17, %s2119_s16 }
   0x7   : > { %p138_p2 = scmp.eq.s32.totalorder %s1431_s21, 1  ;;  %p143_p3 = scmp.ne.s32.totalorder %s2119_s16, %s2115_s15 }
   0x8   : > { %s2963_s23 = smov (%p31_p0, %s29_s23), 0  ;;  %p144_p5 = scmp.eq.s32.totalorder %s1432_s22, 1 }
   0x9   : > { %p2203_p4 = por %p138_p2, %p137_p1  ;;  %s122_s26 = ssub.s32 %s2131_s19, %s2963_s23 }
   0xa   : > { %p1435_p6 = scmp.ge.s32.totalorder %s2135_s20, 1  ;;  %p125_p7 = scmp.eq.s32.totalorder %s122_s26, 0 }
   0xb   : > { %p2210_p8 = por %p144_p5, %p143_p3  ;;  %p179_p9 = scmp.lt.s32.totalorder %s2135_s20, 3 }
   0xc   : > { %s2216_s28 = scalar_select %p125_p7, %s2123_s17, %s127_s24  }
   0xd   : > { %p180_p10 = pnand %p1435_p6, %p179_p9 }
   0xe   : > { %p205_p11 = scmp.lt.s32.totalorder (!%p180_p10), %s2127_s18, 1  ;;  %s2137_s9 = smov (!%p180_p10), 64  }
   0xf   : > { %183 = sbr.rel (%p180_p10) target bundleno = 1015 (0x3f7), region = 36  ;;  %s202_s11 = sand.u32 (!%p180_p10), 1, %s2119_s16  }
  0x10   : > { %s1436_s12 = sshll.u32 (!%p180_p10), %s202_s11, 4 }
  0x11   : > { %s204_s26 = scalar_lea.vmem (!%p180_p10), [#allocation3], %s1436_s12 }
  0x12   : > { %s1356_s29 = sshll.u32 (!%p180_p10), %s204_s26, 4  ;;  %s1357_s29 = int_to_ptr.vmem [resolvable:$true] %s1356_s29 }
  0x14   : > { %v1609_v0 = vld [vmem:[%s2951_s1 + $0x150] sm:$0xf]  ;;  %v1920_v1 = vld [vmem:[%s2951_s1 + $0x164] sm:$0xf0]  ;;  %v1917_v2 = vld [vmem:[%s2951_s1 + $0x154] sm:$0xf] }
  0x15   : > { %v1610_v3 = vor.u32 %v1920_v1, %v1609_v0  ;;  %v1611_v4 = vld [vmem:[%s2951_s1 + $0x168] sm:$0xf0]  ;;  %v1585_v5 = vld [vmem:[%s2951_s1 + $0x120] sm:$0xf]  ;;  %v1914_v6 = vld [vmem:[%s2951_s1 + $0x134] sm:$0xf0] }
  0x16   : > { %v1614_v7 = vor.u32 %v1917_v2, %v1611_v4  ;;  %v1911_v8 = vld [vmem:[%s2951_s1 + $0x124] sm:$0xf]  ;;  %v1587_v9 = vld [vmem:[%s2951_s1 + $0x138] sm:$0xf0]  ;;  %v1586_v10 = vor.u32 %v1914_v6, %v1585_v5  ;;  %v1705_v11 = vld [vmem:[%s2951_s1 + $0x210] sm:$0xf] }
  0x17   : > { %658 = vmatpush.bf16.msra.mxu0 %v1610_v3  ;;  %v1944_v12 = vld [vmem:[%s2951_s1 + $0x224] sm:$0xf0]  ;;  %v1590_v13 = vor.u32 %v1911_v8, %v1587_v9  ;;  %v1561_v14 = vld [vmem:[%s2951_s1 + $0xf0] sm:$0xf]  ;;  %v1905_v17 = vld [vmem:[%s2951_s1 + $0xf4] sm:$0xf] }
  0x18   : > { %684 = vmatpush.bf16.msra.mxu2 %v1614_v7  ;;  %v1908_v15 = vld [vmem:[%s2951_s1 + $0x104] sm:$0xf0]  ;;  %v1706_v16 = vor.u32 %v1944_v12, %v1705_v11  ;;  %v1563_v18 = vld [vmem:[%s2951_s1 + $0x108] sm:$0xf0]  ;;  %v1681_v19 = vld [vmem:[%s2951_s1 + $0x1e0] sm:$0xf] }
  0x19   : > { %v1938_v20 = vld [vmem:[%s2951_s1 + $0x1f4] sm:$0xf0]  ;;  %v1941_v22 = vld [vmem:[%s2951_s1 + $0x214] sm:$0xf]  ;;  %v1562_v23 = vor.u32 %v1908_v15, %v1561_v14  ;;  %v1537_v24 = vld [vmem:[%s2951_s1 + $0xc0] sm:$0xf]  ;;  %v1566_v27 = vor.u32 %v1905_v17, %v1563_v18 }
  0x1a   : > { %675 = vmatpush.bf16.msra.mxu1 %v1706_v16  ;;  %v1682_v21 = vor.u32 %v1938_v20, %v1681_v19  ;;  %v1902_v25 = vld [vmem:[%s2951_s1 + $0xd4] sm:$0xf0]  ;;  %v1707_v26 = vld [vmem:[%s2951_s1 + $0x228] sm:$0xf0]  ;;  %v1899_v28 = vld [vmem:[%s2951_s1 + $0xc4] sm:$0xf] }
  0x1b   : > { %659 = vmatpush.bf16.msra.mxu0 %v1586_v10  ;;  %v1710_v29 = vor.u32 %v1941_v22, %v1707_v26  ;;  %v1657_v30 = vld [vmem:[%s2951_s1 + $0x1b0] sm:$0xf]  ;;  %v1932_v31 = vld [vmem:[%s2951_s1 + $0x1c4] sm:$0xf0]  ;;  %v1539_v32 = vld [vmem:[%s2951_s1 + $0xd8] sm:$0xf0]  ;;  %v1538_v38 = vor.u32 %v1902_v25, %v1537_v24 }
  0x1c   : > { %685 = vmatpush.bf16.msra.mxu2 %v1590_v13  ;;  %v1935_v33 = vld [vmem:[%s2951_s1 + $0x1e4] sm:$0xf]  ;;  %v1683_v34 = vld [vmem:[%s2951_s1 + $0x1f8] sm:$0xf0]  ;;  %v1513_v35 = vld [vmem:[%s2951_s1 + $0x90] sm:$0xf]  ;;  %v1658_v36 = vor.u32 %v1932_v31, %v1657_v30  ;;  %v1542_v42 = vor.u32 %v1899_v28, %v1539_v32 }
  0x1d   : > { %701 = vmatpush.bf16.msra.mxu3 %v1710_v29  ;;  %v1686_v37 = vor.u32 %v1935_v33, %v1683_v34  ;;  %v1896_v39 = vld [vmem:[%s2951_s1 + $0xa4] sm:$0xf0]  ;;  %v1633_v40 = vld [vmem:[%s2951_s1 + $0x180] sm:$0xf]  ;;  %v1926_v41 = vld [vmem:[%s2951_s1 + $0x194] sm:$0xf0] }
  0x1e   : > { %676 = vmatpush.bf16.msra.mxu1 %v1682_v21  ;;  %v1617_v43 = vld [vmem:[%s2951_s1 + $0x158] sm:$0xf]  ;;  %v1921_v44 = vld [vmem:[%s2951_s1 + $0x16c] sm:$0xf0]  ;;  %v1929_v45 = vld [vmem:[%s2951_s1 + $0x1b4] sm:$0xf]  ;;  %v1634_v49 = vor.u32 %v1926_v41, %v1633_v40  ;;  %v1514_v51 = vor.u32 %v1896_v39, %v1513_v35 }
  0x1f   : > { %660 = vmatpush.bf16.msra.mxu0 %v1562_v23  ;;  %v1893_v46 = vld [vmem:[%s2951_s1 + $0x94] sm:$0xf]  ;;  %v1515_v47 = vld [vmem:[%s2951_s1 + $0xa8] sm:$0xf0]  ;;  %v1489_v52 = vld [vmem:[%s2951_s1 + $0x60] sm:$0xf]  ;;  %v1618_v53 = vor.u32 %v1921_v44, %v1617_v43 }
  0x20   : > { %686 = vmatpush.bf16.msra.mxu2 %v1566_v27  ;;  %v1659_v48 = vld [vmem:[%s2951_s1 + $0x1c8] sm:$0xf0]  ;;  %v1923_v54 = vld [vmem:[%s2951_s1 + $0x184] sm:$0xf]  ;;  %v1635_v55 = vld [vmem:[%s2951_s1 + $0x198] sm:$0xf0]  ;;  %v1518_v56 = vor.u32 %v1893_v46, %v1515_v47 }
  0x21   : > { %702 = vmatpush.bf16.msra.mxu3 %v1686_v37  ;;  %v1662_v50 = vor.u32 %v1929_v45, %v1659_v48  ;;  %v1890_v57 = vld [vmem:[%s2951_s1 + $0x74] sm:$0xf0]  ;;  %v1593_v58 = vld [vmem:[%s2951_s1 + $0x128] sm:$0xf]  ;;  %v1915_v59 = vld [vmem:[%s2951_s1 + $0x13c] sm:$0xf0]  ;;  %v1638_v63 = vor.u32 %v1923_v54, %v1635_v55 }
  0x22   : > { %677 = vmatpush.bf16.msra.mxu1 %v1658_v36  ;;  %v1887_v60 = vld [vmem:[%s2951_s1 + $0x64] sm:$0xf]  ;;  %v1491_v61 = vld [vmem:[%s2951_s1 + $0x78] sm:$0xf0]  ;;  %v1465_v62 = vld [vmem:[%s2951_s1 + $0x30] sm:$0xf]  ;;  %v1490_v0 = vor.u32 %v1890_v57, %v1489_v52  ;;  %v1594_v2 = vor.u32 %v1915_v59, %v1593_v58 }
  0x23   : > { %661 = vmatpush.bf16.msra.mxu0 %v1538_v38  ;;  %v1884_v1 = vld [vmem:[%s2951_s1 + $0x44] sm:$0xf0]  ;;  %v1713_v3 = vld [vmem:[%s2951_s1 + $0x218] sm:$0xf]  ;;  %v1945_v4 = vld [vmem:[%s2951_s1 + $0x22c] sm:$0xf0]  ;;  %v1494_v5 = vor.u32 %v1887_v60, %v1491_v61 }
  0x24   : > { %687 = vmatpush.bf16.msra.mxu2 %v1542_v42  ;;  %v1569_v6 = vld [vmem:[%s2951_s1 + $0xf8] sm:$0xf]  ;;  %v1909_v7 = vld [vmem:[%s2951_s1 + $0x10c] sm:$0xf0]  ;;  %s206_s7 = scalar_select %p205_p11, %s2127_s18, 1  ;;  %v1714_v8 = vor.u32 %v1945_v4, %v1713_v3  ;;  %v1466_v15 = vor.u32 %v1884_v1, %v1465_v62  ;;  %vm654_vm0 = vcmask 523264  }
  0x25   : > { %703 = vmatpush.bf16.msra.mxu3 %v1662_v50  ;;  %v1881_v9 = vld [vmem:[%s2951_s1 + $0x34] sm:$0xf]  ;;  %v1467_v10 = vld [vmem:[%s2951_s1 + $0x48] sm:$0xf0]  ;;  %v1441_v11 = vld [vmem:[%s2951_s1] sm:$0xf]  ;;  %v1570_v18 = vor.u32 %v1909_v7, %v1569_v6 }
  0x26   : > { %678 = vmatpush.bf16.msra.mxu1 %v1634_v49  ;;  %v1878_v12 = vld [vmem:[%s2951_s1 + $0x14] sm:$0xf0]  ;;  %s1874_s22 = sshll.u32 %s206_s7, 3  ;;  %v1689_v13 = vld [vmem:[%s2951_s1 + $0x1e8] sm:$0xf]  ;;  %v1470_v20 = vor.u32 %v1881_v9, %v1467_v10  ;;  %vm871_vm1 = vcmask 1043456  }
  0x27   : > { %662 = vmatpush.bf16.msra.mxu0 %v1514_v51  ;;  %v1939_v14 = vld [vmem:[%s2951_s1 + $0x1fc] sm:$0xf0]  ;;  %v1875_v16 = vld [vmem:[%s2951_s1 + $0x4] sm:$0xf]  ;;  %v1443_v17 = vld [vmem:[%s2951_s1 + $0x18] sm:$0xf0]  ;;  %s209_s13 = scalar_lea.vmem %s2950_s0, %s1874_s22  ;;  %v1442_v31 = vor.u32 %v1878_v12, %v1441_v11 }
  0x28   : > { %688 = vmatpush.bf16.msra.mxu2 %v1518_v56  ;;  %v1918_v19 = vld [vmem:[%s2951_s1 + $0x15c] sm:$0xf]  ;;  %v215_v21 = vld [vmem:[%s209_s13] sm:$0xff]  ;;  %v1545_v22 = vld [vmem:[%s2951_s1 + $0xc8] sm:$0xf]  ;;  %v1690_v24 = vor.u32 %v1939_v14, %v1689_v13  ;;  %v1446_v35 = vor.u32 %v1875_v16, %v1443_v17  ;;  %vm857_vm3 = vcmask 64512  }
  0x29   : > { %704 = vmatpush.bf16.msra.mxu3 %v1638_v63  ;;  %v1903_v23 = vld [vmem:[%s2951_s1 + $0xdc] sm:$0xf0]  ;;  %v1619_v25 = vld [vmem:[%s2951_s1 + $0x170] sm:$0xf0]  ;;  %v290_v26 = vunpack.c.h.b16 %v215_v21  ;;  %v1942_v27 = vld [vmem:[%s2951_s1 + $0x21c] sm:$0xf]  ;;  %v289_v33 = vunpack.c.l.b16 %v215_v21 }
  0x2a   : > { %710 = vmatpush.bf16.msrb.mxu1 %v1618_v53  ;;  %v1715_v28 = vld [vmem:[%s2951_s1 + $0x230] sm:$0xf0]  ;;  %v1665_v29 = vld [vmem:[%s2951_s1 + $0x1b8] sm:$0xf]  ;;  %v1933_v30 = vld [vmem:[%s2951_s1 + $0x1cc] sm:$0xf0]  ;;  %v1546_v34 = vor.u32 %v1903_v23, %v1545_v22  ;;  %v1622_v36 = vor.u32 %v1918_v19, %v1619_v25 }
  0x2b   : > { %663 = vmatpush.bf16.msra.mxu0 %v1490_v0  ;;  %v2421_v32 = vpack.c.b16 %v290_v26, %v290_v26  ;;  %v1521_v37 = vld [vmem:[%s2951_s1 + $0x98] sm:$0xf]  ;;  %v1897_v38 = vld [vmem:[%s2951_s1 + $0xac] sm:$0xf0]  ;;  %v1718_v39 = vor.u32 %v1942_v27, %v1715_v28  ;;  %v1912_v40 = vld [vmem:[%s2951_s1 + $0x12c] sm:$0xf]  ;;  %v1666_v43 = vor.u32 %v1933_v30, %v1665_v29  ;;  %v2451_v47 = vpack.c.b16 %v289_v33, %v289_v33 }
  0x2c   : > { %689 = vmatpush.bf16.msra.mxu2 %v1494_v5  ;;  %v1595_v41 = vld [vmem:[%s2951_s1 + $0x140] sm:$0xf0]  ;;  %v1936_v42 = vld [vmem:[%s2951_s1 + $0x1ec] sm:$0xf]  ;;  %v1641_v45 = vld [vmem:[%s2951_s1 + $0x188] sm:$0xf]  ;;  %v1522_v48 = vor.u32 %v1897_v38, %v1521_v37 }
  0x2d   : > { %727 = vmatpush.bf16.msrb.mxu3 %v1714_v8  ;;  %1727 = vmatmul.msk.bf16.vlgmr.msra.gmra.mxu1 %vm654_vm0, %v2421_v32  ;;  %v1691_v44 = vld [vmem:[%s2951_s1 + $0x200] sm:$0xf0]  ;;  %v1927_v46 = vld [vmem:[%s2951_s1 + $0x19c] sm:$0xf0]  ;;  %v1598_v49 = vor.u32 %v1912_v40, %v1595_v41  ;;  %v1906_v50 = vld [vmem:[%s2951_s1 + $0xfc] sm:$0xf] }
  0x2e   : > { %711 = vmatpush.bf16.msrb.mxu1 %v1594_v2  ;;  %1728 = vmatmul.msk.bf16.vlgmr.msra.gmra.mxu3 %vm654_vm0, %v2421_v32  ;;  %v1497_v51 = vld [vmem:[%s2951_s1 + $0x68] sm:$0xf]  ;;  %v1891_v52 = vld [vmem:[%s2951_s1 + $0x7c] sm:$0xf0]  ;;  %v1694_v53 = vor.u32 %v1936_v42, %v1691_v44  ;;  %v1571_v54 = vld [vmem:[%s2951_s1 + $0x110] sm:$0xf0]  ;;  %v1642_v55 = vor.u32 %v1927_v46, %v1641_v45 }
  0x2f   : > { %664 = vmatpush.bf16.msra.mxu0 %v1466_v15  ;;  %v1625_v56 = vld [vmem:[%s2951_s1 + $0x160] sm:$0xf]  ;;  %v1922_v57 = vld [vmem:[%s2951_s1 + $0x174] sm:$0xf0]  ;;  %v1930_v58 = vld [vmem:[%s2951_s1 + $0x1bc] sm:$0xf]  ;;  %v1498_v61 = vor.u32 %v1891_v52, %v1497_v51  ;;  %v1574_v0 = vor.u32 %v1906_v50, %v1571_v54 }
  0x30   : > { %690 = vmatpush.bf16.msra.mxu2 %v1470_v20  ;;  %v1667_v59 = vld [vmem:[%s2951_s1 + $0x1d0] sm:$0xf0]  ;;  %v1626_v60 = vor.u32 %v1922_v57, %v1625_v56  ;;  %v1601_v62 = vld [vmem:[%s2951_s1 + $0x130] sm:$0xf]  ;;  %v1916_v63 = vld [vmem:[%s2951_s1 + $0x144] sm:$0xf0] }
  0x31   : > { %728 = vmatpush.bf16.msrb.mxu3 %v1690_v24  ;;  %v1473_v1 = vld [vmem:[%s2951_s1 + $0x38] sm:$0xf]  ;;  %v1885_v2 = vld [vmem:[%s2951_s1 + $0x4c] sm:$0xf0]  ;;  %v1670_v3 = vor.u32 %v1930_v58, %v1667_v59  ;;  %v1900_v4 = vld [vmem:[%s2951_s1 + $0xcc] sm:$0xf]  ;;  %v1602_v9 = vor.u32 %v1916_v63, %v1601_v62 }
  0x32   : > { %712 = vmatpush.bf16.msrb.mxu1 %v1570_v18  ;;  %v1547_v5 = vld [vmem:[%s2951_s1 + $0xe0] sm:$0xf0]  ;;  %v1924_v6 = vld [vmem:[%s2951_s1 + $0x18c] sm:$0xf]  ;;  %v1474_v10 = vor.u32 %v1885_v2, %v1473_v1  ;;  %v1627_v11 = vld [vmem:[%s2951_s1 + $0x178] sm:$0xf0] }
  0x33   : > { %665 = vmatpush.bf16.msra.mxu0 %v1442_v31  ;;  %v1643_v7 = vld [vmem:[%s2951_s1 + $0x1a0] sm:$0xf0]  ;;  %v1577_v12 = vld [vmem:[%s2951_s1 + $0x100] sm:$0xf]  ;;  %v1910_v13 = vld [vmem:[%s2951_s1 + $0x114] sm:$0xf0]  ;;  %v1550_v14 = vor.u32 %v1900_v4, %v1547_v5 }
  0x34   : > { %691 = vmatpush.bf16.msra.mxu2 %v1446_v35  ;;  %v1919_v8 = vld [vmem:[%s2951_s1 + $0x164] sm:$0xf]  ;;  %v1894_v15 = vld [vmem:[%s2951_s1 + $0x9c] sm:$0xf]  ;;  %v1449_v16 = vld [vmem:[%s2951_s1 + $0x8] sm:$0xf]  ;;  %v1646_v18 = vor.u32 %v1924_v6, %v1643_v7  ;;  %v1578_v23 = vor.u32 %v1910_v13, %v1577_v12 }
  0x35   : > { %729 = vmatpush.bf16.msrb.mxu3 %v1666_v43  ;;  %v1879_v17 = vld [vmem:[%s2951_s1 + $0x1c] sm:$0xf0]  ;;  %v1523_v19 = vld [vmem:[%s2951_s1 + $0xb0] sm:$0xf0]  ;;  %v1946_v21 = vld [vmem:[%s2951_s1 + $0x234] sm:$0xf0]  ;;  %v1630_v22 = vor.u32 %v1919_v8, %v1627_v11 }
  0x36   : > { %713 = vmatpush.bf16.msrb.mxu1 %v1546_v34  ;;  %666 = vmatmul.bf16.vlgmr.msra.gmra.mxu0 %v2451_v47  ;;  %v1721_v20 = vld [vmem:[%s2951_s1 + $0x220] sm:$0xf]  ;;  %v1450_v24 = vor.u32 %v1879_v17, %v1449_v16  ;;  %v1913_v25 = vld [vmem:[%s2951_s1 + $0x134] sm:$0xf]  ;;  %v1603_v26 = vld [vmem:[%s2951_s1 + $0x148] sm:$0xf0]  ;;  %v1526_v27 = vor.u32 %v1894_v15, %v1523_v19 }
  0x37   : > { %736 = vmatpush.bf16.msrb.mxu0 %v1622_v36  ;;  %692 = vmatmul.bf16.vlgmr.msra.gmra.mxu2 %v2451_v47  ;;  %v1888_v28 = vld [vmem:[%s2951_s1 + $0x6c] sm:$0xf]  ;;  %v1553_v29 = vld [vmem:[%s2951_s1 + $0xd0] sm:$0xf]  ;;  %v1904_v30 = vld [vmem:[%s2951_s1 + $0xe4] sm:$0xf0]  ;;  %v1722_v31 = vor.u32 %v1946_v21, %v1721_v20  ;;  %v1606_v36 = vor.u32 %v1913_v25, %v1603_v26 }
  0x38   : > { %753 = vmatpush.bf16.msrb.mxu2 %v1718_v39  ;;  %v1499_v33 = vld [vmem:[%s2951_s1 + $0x80] sm:$0xf0]  ;;  %v1697_v34 = vld [vmem:[%s2951_s1 + $0x1f0] sm:$0xf]  ;;  %v1940_v35 = vld [vmem:[%s2951_s1 + $0x204] sm:$0xf0]  ;;  %v1554_v39 = vor.u32 %v1904_v30, %v1553_v29 }
  0x39   : > { %730 = vmatpush.bf16.msrb.mxu3 %v1642_v55  ;;  %v1907_v37 = vld [vmem:[%s2951_s1 + $0x104] sm:$0xf]  ;;  %v1579_v38 = vld [vmem:[%s2951_s1 + $0x118] sm:$0xf0]  ;;  %v1502_v40 = vor.u32 %v1888_v28, %v1499_v33  ;;  %v1529_v42 = vld [vmem:[%s2951_s1 + $0xa0] sm:$0xf]  ;;  %v1698_v44 = vor.u32 %v1940_v35, %v1697_v34 }
  0x3a   : > { %714 = vmatpush.bf16.msrb.mxu1 %v1522_v48  ;;  %v1882_v41 = vld [vmem:[%s2951_s1 + $0x3c] sm:$0xf]  ;;  %v1898_v43 = vld [vmem:[%s2951_s1 + $0xb4] sm:$0xf0]  ;;  %v1475_v45 = vld [vmem:[%s2951_s1 + $0x50] sm:$0xf0] }
  0x3b   : > { %737 = vmatpush.bf16.msrb.mxu0 %v1598_v49  ;;  %v1673_v46 = vld [vmem:[%s2951_s1 + $0x1c0] sm:$0xf]  ;;  %v1934_v48 = vld [vmem:[%s2951_s1 + $0x1d4] sm:$0xf0]  ;;  %v1582_v49 = vor.u32 %v1907_v37, %v1579_v38  ;;  %v1901_v50 = vld [vmem:[%s2951_s1 + $0xd4] sm:$0xf]  ;;  %v1530_v52 = vor.u32 %v1898_v43, %v1529_v42 }
  0x3c   : > { %754 = vmatpush.bf16.msrb.mxu2 %v1694_v53  ;;  %v1555_v51 = vld [vmem:[%s2951_s1 + $0xe8] sm:$0xf0]  ;;  %v1478_v53 = vor.u32 %v1882_v41, %v1475_v45  ;;  %v1505_v55 = vld [vmem:[%s2951_s1 + $0x70] sm:$0xf]  ;;  %v1892_v56 = vld [vmem:[%s2951_s1 + $0x84] sm:$0xf0]  ;;  %v1674_v57 = vor.u32 %v1934_v48, %v1673_v46 }
  0x3d   : > { %762 = vmatpush.bf16.msra.mxu3 %v1626_v60  ;;  %v1876_v54 = vld [vmem:[%s2951_s1 + $0xc] sm:$0xf]  ;;  %v1451_v58 = vld [vmem:[%s2951_s1 + $0x20] sm:$0xf0]  ;;  %v1649_v59 = vld [vmem:[%s2951_s1 + $0x190] sm:$0xf]  ;;  %v1506_v2 = vor.u32 %v1892_v56, %v1505_v55 }
  0x3e   : > { %715 = vmatpush.bf16.msrb.mxu1 %v1498_v61  ;;  %1729 = vmatmul.msk.bf16.vlgmr.msrb.gmra.mxu3 %vm654_vm0, %v2421_v32  ;;  %v1928_v60 = vld [vmem:[%s2951_s1 + $0x1a4] sm:$0xf0]  ;;  %v1558_v61 = vor.u32 %v1901_v50, %v1555_v51  ;;  %v1943_v62 = vld [vmem:[%s2951_s1 + $0x224] sm:$0xf]  ;;  %v1723_v63 = vld [vmem:[%s2951_s1 + $0x238] sm:$0xf0] }
  0x3f   : > { %738 = vmatpush.bf16.msrb.mxu0 %v1574_v0  ;;  %v1895_v0 = vld [vmem:[%s2951_s1 + $0xa4] sm:$0xf]  ;;  %v1531_v1 = vld [vmem:[%s2951_s1 + $0xb8] sm:$0xf0]  ;;  %v1481_v4 = vld [vmem:[%s2951_s1 + $0x40] sm:$0xf]  ;;  %v1650_v6 = vor.u32 %v1928_v60, %v1649_v59  ;;  %v1726_v7 = vor.u32 %v1943_v62, %v1723_v63 }
  0x40   : > { %755 = vmatpush.bf16.msrb.mxu2 %v1670_v3  ;;  %v1454_v3 = vor.u32 %v1876_v54, %v1451_v58  ;;  %v1886_v5 = vld [vmem:[%s2951_s1 + $0x54] sm:$0xf0]  ;;  %v1534_v8 = vor.u32 %v1895_v0, %v1531_v1  ;;  %v1889_v11 = vld [vmem:[%s2951_s1 + $0x74] sm:$0xf]  ;;  %v1507_v12 = vld [vmem:[%s2951_s1 + $0x88] sm:$0xf0] }
  0x41   : > { %763 = vmatpush.bf16.msra.mxu3 %v1602_v9  ;;  %v1937_v9 = vld [vmem:[%s2951_s1 + $0x1f4] sm:$0xf]  ;;  %v1482_v13 = vor.u32 %v1886_v5, %v1481_v4  ;;  %v1880_v15 = vld [vmem:[%s2951_s1 + $0x24] sm:$0xf0]  ;;  %v1510_v17 = vor.u32 %v1889_v11, %v1507_v12  ;;  %v1675_v19 = vld [vmem:[%s2951_s1 + $0x1d8] sm:$0xf0] }
  0x42   : > { %716 = vmatpush.bf16.msrb.mxu1 %v1474_v10  ;;  %v1699_v10 = vld [vmem:[%s2951_s1 + $0x208] sm:$0xf0]  ;;  %v1883_v20 = vld [vmem:[%s2951_s1 + $0x44] sm:$0xf]  ;;  %v1483_v21 = vld [vmem:[%s2951_s1 + $0x58] sm:$0xf0] }
  0x43   : > { %739 = vmatpush.bf16.msrb.mxu0 %v1550_v14  ;;  %v1457_v14 = vld [vmem:[%s2951_s1 + $0x10] sm:$0xf]  ;;  %v1702_v16 = vor.u32 %v1937_v9, %v1699_v10  ;;  %v1925_v25 = vld [vmem:[%s2951_s1 + $0x194] sm:$0xf]  ;;  %v1651_v26 = vld [vmem:[%s2951_s1 + $0x1a8] sm:$0xf0] }
  0x44   : > { %756 = vmatpush.bf16.msrb.mxu2 %v1646_v18  ;;  %v1931_v18 = vld [vmem:[%s2951_s1 + $0x1c4] sm:$0xf]  ;;  %v1459_v28 = vld [vmem:[%s2951_s1 + $0x28] sm:$0xf0]  ;;  %v1654_v29 = vor.u32 %v1925_v25, %v1651_v26  ;;  %s1979_s13 = sshll.u32 %s2127_s18, 4  ;;  %s1341_s18 = scalar_lea.sflag [#allocation4], %s202_s11 }
  0x45   : > { %764 = vmatpush.bf16.msra.mxu3 %v1578_v23  ;;  %v1678_v23 = vor.u32 %v1931_v18, %v1675_v19  ;;  %s1354_s24 = scalar_lea.hbm %s2954_s4, %s1979_s13 }
  0x46   : > { %717 = vmatpush.bf16.msrb.mxu1 %v1450_v24  ;;  %v1486_v24 = vor.u32 %v1883_v20, %v1483_v21  ;;  %s1358_s30 = sshll.u32 %s1354_s24, 4  ;;  %s1359_s30 = int_to_ptr.hbm [resolvable:$true] %s1358_s30 }
  0x47   : > { %740 = vmatpush.bf16.msrb.mxu0 %v1526_v27  ;;  %1730 = vmatmul.msk.bf16.vlgmr.msrb.gmra.mxu2 %vm654_vm0, %v2421_v32  ;;  %v1877_v27 = vld [vmem:[%s2951_s1 + $0x14] sm:$0xf]  ;;  %s2071_s22 = sshra.s32 %s1359_s30, 4  ;;  %s2072_s22 = int_to_ptr.hbm [resolvable:$true] %s2071_s22 }
  0x48   : > { %788 = vmatpush.bf16.msra.mxu2 %v1630_v22  ;;  %v1458_v22 = vor.u32 %v1880_v15, %v1457_v14  ;;  %v1462_v30 = vor.u32 %v1877_v27, %v1459_v28  ;;  %s2073_s5 = scalar_lea.hbm %s2072_s22, 16  ;;  %p2078_p1 = scmp.lt.s32.totalorder %s2072_s22, %s2954_s4 }
  0x49   : > { %718 = vmatmul.bf16.vlgmr.msrb.gmra.mxu1 %v2451_v47  ;;  %765 = vmatpush.bf16.msra.mxu3 %v1554_v39  ;;  %p2074_p12 = scmp.ne.s32.totalorder %s2072_s22, %s2073_s5 }
  0x4a   : > { %779 = vmatpush.bf16.msra.mxu1 %v1722_v31 }
  0x4b   : > { %741 = vmatpush.bf16.msrb.mxu0 %v1502_v40  ;;  %p2075_p13 = pnand %p2074_p12, %p2203_p4 }
  0x4c   : > { %789 = vmatpush.bf16.msra.mxu2 %v1606_v36 }
  0x4d   : > { %766 = vmatpush.bf16.msra.mxu3 %v1530_v52  ;;  %p2076_p0 = pneg %p2075_p13 }
  0x4e   : > { %780 = vmatpush.bf16.msra.mxu1 %v1698_v44 }
  0x4f   : > { %742 = vmatpush.bf16.msrb.mxu0 %v1478_v53 }
  0x50   : > { %790 = vmatpush.bf16.msra.mxu2 %v1582_v49 }
  0x51   : > { %767 = vmatpush.bf16.msra.mxu3 %v1506_v2 }
  0x52   : > { %781 = vmatpush.bf16.msra.mxu1 %v1674_v57 }
  0x53   : > { %743 = vmatpush.bf16.msrb.mxu0 %v1454_v3 }
  0x54   : > { %791 = vmatpush.bf16.msra.mxu2 %v1558_v61 }
  0x55   : > { %768 = vmatpush.bf16.msra.mxu3 %v1482_v13 }
  0x56   : > { %782 = vmatpush.bf16.msra.mxu1 %v1650_v6  ;;  %744 = vmatmul.bf16.vlgmr.msrb.gmra.mxu0 %v2451_v47 }
  0x57   : > { %805 = vmatpush.bf16.msra.mxu0 %v1726_v7 }
  0x58   : > { %792 = vmatpush.bf16.msra.mxu2 %v1534_v8 }
  0x59   : > { %1731 = vmatmul.msk.bf16.vlgmr.msra.gmra.mxu1 %vm654_vm0, %v2421_v32  ;;  %769 = vmatpush.bf16.msra.mxu3 %v1458_v22 }
  0x5b   : > { %806 = vmatpush.bf16.msra.mxu0 %v1702_v16 }
  0x5c   : > { %793 = vmatpush.bf16.msra.mxu2 %v1510_v17  ;;  %770 = vmatmul.bf16.vlgmr.msra.gmra.mxu3 %v2451_v47 }
  0x5f   : > { %807 = vmatpush.bf16.msra.mxu0 %v1678_v23 }
  0x60   : > { %794 = vmatpush.bf16.msra.mxu2 %v1486_v24  ;;  %v821_v24 = vlaneseq }
  0x62   : > { %v822_v26 = vshrl.u32 %v821_v24, 7  ;;  %v826_v27 = vand.u32 127, %v821_v24  ;;  %v1799_v24 = vld [vmem:[%s2952_s2 + $0x70] sm:$0xf] }
  0x63   : > { %808 = vmatpush.bf16.msra.mxu0 %v1654_v29 }
  0x64   : > { %795 = vmatpush.bf16.msra.mxu2 %v1462_v30  ;;  %vm827_vm2 = vcmp.le.s32.totalorder %v826_v27, %v822_v26  ;;  %v1863_v26 = vld [vmem:[%s2952_s2 + $0xf0] sm:$0xf] }
  0x66   : > { %1732 = vmatmul.msk.bf16.vlgmr.msra.gmra.mxu0 %vm654_vm0, %v2421_v32 }
  0x67   : > { %796 = vmatmul.bf16.vlgmr.msra.gmra.mxu2 %v2451_v47 }
  0xaa   : > { %v680_v31 = vpop.f32.mrf.mxu1 }
  0xb1   : > { %v706_v34 = vpop.f32.mrf.mxu3 }
  0xb2   : > { %v682_v35 = vpop.f32.mrf.mxu1 }
  0xb3   : > { %v667_v33 = vpop.f32.mrf.mxu0 }
  0xb4   : > { %v681_v36 = vadd.f32 %v680_v31, %v667_v33 }
  0xb9   : > { %v708_v40 = vpop.f32.mrf.mxu3 }
  0xba   : > { %v693_v37 = vpop.f32.mrf.mxu2 }
  0xbb   : > { %v707_v38 = vadd.f32 %v706_v34, %v693_v37  ;;  %v669_v39 = vpop.f32.mrf.mxu0 }
  0xbd   : > { %v814_v41 = vpack.c.bf16 %v707_v38, %v681_v36 }
  0xbf   : > { %817 = vst [vmem:[#allocation2] sm:$0xff] %v814_v41 }
  0xc1   : > { %v732_v44 = vpop.f32.mrf.mxu3 }
  0xc2   : > { %v695_v42 = vpop.f32.mrf.mxu2 }
  0xc6   : > { %v719_v43 = vpop.f32.mrf.mxu1  ;;  %v833_v0 = vld [vmem:[#allocation2] sm:$0xf]  ;;  %v956_v1 = vld [vmem:[#allocation2 + $0x4] sm:$0xf] }
  0xc7   : > { %v733_v48 = vadd.f32 %v732_v44, %v719_v43  ;;  %v1011_v3 = vunpack.c.l.b16 %v956_v1  ;;  %v891_v4 = vunpack.c.l.b16 %v833_v0 }
  0xc9   : > { %v734_v47 = vpop.f32.mrf.mxu3  ;;  %v1012_v9 = vpack.c.b16 %v1011_v3, %v1011_v3  ;;  %v892_v10 = vpack.c.b16 %v891_v4, %v891_v4 }
  0xca   : > { %v758_v45 = vpop.f32.mrf.mxu2 }
  0xce   : > { %v721_v46 = vpop.f32.mrf.mxu1 }
  0xd2   : > { %v760_v50 = vpop.f32.mrf.mxu2 }
  0xd3   : > { %v745_v49 = vpop.f32.mrf.mxu0 }
  0xd4   : > { %v759_v32 = vadd.f32 %v758_v45, %v745_v49 }
  0xd6   : > { %v815_v51 = vpack.c.bf16 %v759_v32, %v733_v48  ;;  %v784_v52 = vpop.f32.mrf.mxu1 }
  0xd8   : > { %818 = vst [vmem:[#allocation2 + $0x8] sm:$0xff] %v815_v51 }
  0xdb   : > { %v747_v53 = vpop.f32.mrf.mxu0 }
  0xde   : > { %v786_v54 = vpop.f32.mrf.mxu1 }
  0xdf   : > { %v834_v55 = vld [vmem:[#allocation2 + $0x8] sm:$0xf]  ;;  %v957_v56 = vld [vmem:[#allocation2 + $0xc] sm:$0xf]  ;;  %v771_v61 = vpop.f32.mrf.mxu3 }
  0xe0   : > { %v841_v57 = vsel %vm654_vm0, %v834_v55, 0  ;;  %v963_v58 = vsel %vm654_vm0, %v957_v56, 0  ;;  %v1016_v59 = vunpack.c.l.b16 %v957_v56  ;;  %v896_v60 = vunpack.c.l.b16 %v834_v55 }
  0xe1   : > { %850 = vmatpush.bf16.xpose.msrb.mxu1 %v841_v57  ;;  %972 = vmatpush.bf16.xpose.msrb.mxu2 %v963_v58  ;;  %v785_v5 = vadd.f32 %v784_v52, %v771_v61 }
  0xe2   : > { %v1017_v62 = vpack.c.b16 %v1016_v59, %v1016_v59  ;;  %v897_v63 = vpack.c.b16 %v896_v60, %v896_v60 }
  0xe3   : > { %v810_v2 = vpop.f32.mrf.mxu0 }
  0xe4   : > { %1018 = vrot.lane.b32.xlu1 %v1017_v62, %s2137_s9  ;;  %898 = vrot.lane.b32.xlu0 %v897_v63, %s2137_s9 }
  0xe7   : > { %v773_v8 = vpop.f32.mrf.mxu3 }
  0xe8   : > { %1733 = vmatmul.msk.bf16.vlgmr.msrb.gmra.mxu1 %vm654_vm0, %v833_v0  ;;  %1737 = vmatmul.msk.bf16.vlgmr.msrb.gmra.mxu2 %vm654_vm0, %v956_v1 }
  0xea   : > { %v797_v6 = vpop.f32.mrf.mxu2 }
  0xeb   : > { %v811_v7 = vadd.f32 %v810_v2, %v797_v6  ;;  %v812_v12 = vpop.f32.mrf.mxu0 }
  0xec   : > { %1013 = vrot.lane.b32.xlu1 %v1012_v9, %s2137_s9  ;;  %893 = vrot.lane.b32.xlu0 %v892_v10, %s2137_s9 }
  0xed   : > { %v816_v11 = vpack.c.bf16 %v811_v7, %v785_v5 }
  0xef   : > { %819 = vst [vmem:[#allocation2 + $0x10] sm:$0xff] %v816_v11 }
  0xf2   : > { %v799_v13 = vpop.f32.mrf.mxu2 }
  0xf6   : > { %v958_v14 = vld [vmem:[#allocation2 + $0x14] sm:$0xf]  ;;  %v835_v17 = vld [vmem:[#allocation2 + $0x10] sm:$0xf] }
  0xf7   : > { %v1051_v15 = vunpack.c.l.b16 %v958_v14  ;;  %v873_v18 = vsel %vm871_vm1, %v835_v17, 0  ;;  %v993_v19 = vsel %vm871_vm1, %v958_v14, 0  ;;  %v931_v32 = vunpack.c.l.b16 %v835_v17 }
  0xf8   : > { %882 = vmatpush.bf16.msrb.mxu3 %v873_v18 }
  0xf9   : > { %v1052_v16 = vpack.c.b16 %v1051_v15, %v1051_v15  ;;  %v932_v51 = vpack.c.b16 %v931_v32, %v931_v32 }
  0xfb   : > { %1053 = vrot.lane.b32.xlu1 %v1052_v16, %s2137_s9 }
  0xfc   : > { %1002 = vmatpush.bf16.msra.mxu3 %v993_v19 }
 0x156   : > { %v1019_v20 = vpop.permute.xlu1 %1018  ;;  %v899_v21 = vpop.permute.xlu0 %898 }
 0x157   : > { %v1024_v22 = vsel %vm654_vm0, %v1019_v20, 0  ;;  %v904_v23 = vsel %vm654_vm0, %v899_v21, 0 }
 0x158   : > { %913 = vmatpush.bf16.xpose.msrb.mxu0 %v904_v23 }
 0x15e   : > { %v894_v25 = vpop.permute.xlu0 %893  ;;  %v1014_v34 = vpop.permute.xlu1 %1013 }
 0x15f   : > { %1735 = vmatmul.msk.bf16.vlgmr.msrb.gmra.mxu0 %vm654_vm0, %v894_v25  ;;  %v1962_v25 = vld [vmem:[%s2952_s2 + $0x74] sm:$0xf0] }
 0x160   : > { %1033 = vmatpush.bf16.xpose.msra.mxu0 %v1024_v22  ;;  %v1800_v27 = vor.u32 %v1962_v25, %v1799_v24  ;;  %v1968_v24 = vld [vmem:[%s2952_s2 + $0xa4] sm:$0xf0]  ;;  %v1951_v25 = vld [vmem:[%s2952_s2 + $0x24] sm:$0xf] }
 0x162   : > { %1286 = vmatpush.bf16.msra.mxu2 %v1800_v27  ;;  %v1967_v27 = vld [vmem:[%s2952_s2 + $0xa4] sm:$0xf] }
 0x165   : > { %v852_v28 = vpop.f32.mrf.mxu1 }
 0x166   : > { %v856_v29 = vsel %vm827_vm2, %v852_v28, -inf  ;;  %v1978_v28 = vld [vmem:[%s2952_s2 + $0xf4] sm:$0xf0] }
 0x167   : > { %v858_v30 = vsel %vm857_vm3, %v856_v29, -inf }
 0x168   : > { %859 = vmax.xlane.f32.xlu1 %v858_v30  ;;  %v1801_v30 = vld [vmem:[%s2952_s2 + $0x78] sm:$0xf0] }
 0x16b   : > { %v974_v31 = vpop.f32.mrf.mxu2 }
 0x16c   : > { %v978_v52 = vsel %vm827_vm2, %v974_v31, -inf  ;;  %v1864_v31 = vor.u32 %v1978_v28, %v1863_v26  ;;  %v1761_v26 = vld [vmem:[%s2952_s2 + $0x28] sm:$0xf0] }
 0x16d   : > { %v854_v33 = vpop.f32.mrf.mxu1  ;;  %v1054_v36 = vpop.permute.xlu1 %1053  ;;  %v979_v53 = vsel %vm857_vm3, %v978_v52, -inf  ;;  %v1825_v28 = vld [vmem:[%s2952_s2 + $0xa8] sm:$0xf0] }
 0x16e   : > { %v1059_v59 = vsel %vm871_vm1, %v1054_v36, 0  ;;  %v1791_v36 = vld [vmem:[%s2952_s2 + $0x60] sm:$0xf] }
 0x16f   : > { %1739 = vmatmul.msk.bf16.vlgmr.msra.gmra.mxu0 %vm654_vm0, %v1014_v34  ;;  %v1977_v34 = vld [vmem:[%s2952_s2 + $0xf4] sm:$0xf] }
 0x173   : > { %v976_v35 = vpop.f32.mrf.mxu2 }
 0x174   : > { %v1865_v35 = vld [vmem:[%s2952_s2 + $0xf8] sm:$0xf0] }
 0x1db   : > { %v860_v37 = vpop.xlane.xlu1 %859 }
 0x1dc   : > { %v861_v38 = vsub.f32 %v856_v29, %v860_v37  ;;  %v915_v39 = vpop.f32.mrf.mxu0  ;;  %v1961_v29 = vld [vmem:[%s2952_s2 + $0x74] sm:$0xf]  ;;  %v1868_v37 = vor.u32 %v1977_v34, %v1865_v35  ;;  %v1950_v34 = vld [vmem:[%s2952_s2 + $0x14] sm:$0xf0]  ;;  %v1815_v35 = vld [vmem:[%s2952_s2 + $0x90] sm:$0xf] }
 0x1dd   : > { %v919_v40 = vsel %vm827_vm2, %v915_v39, -inf  ;;  %v1804_v33 = vor.u32 %v1961_v29, %v1801_v30  ;;  %v1855_v39 = vld [vmem:[%s2952_s2 + $0xe0] sm:$0xf] }
 0x1de   : > { %v862_v41 = vmul.f32 1.442695, %v861_v38  ;;  %v920_v42 = vsel %vm857_vm3, %v919_v40, -inf  ;;  %v1960_v38 = vld [vmem:[%s2952_s2 + $0x64] sm:$0xf0] }
 0x1df   : > { %921 = vmax.xlane.f32.xlu2 %v920_v42  ;;  %1312 = vmatpush.bf16.msrb.mxu0 %v1804_v33  ;;  %v1751_v33 = vld [vmem:[%s2952_s2 + $0x10] sm:$0xf] }
 0x1e0   : > { %2041 = vpow2.f32 %v862_v41  ;;  %v1792_v41 = vor.u32 %v1960_v38, %v1791_v36  ;;  %v1828_v36 = vor.u32 %v1967_v27, %v1825_v28  ;;  %v1949_v38 = vld [vmem:[%s2952_s2 + $0x14] sm:$0xf] }
 0x1e2   : > { %1287 = vmatpush.bf16.msra.mxu2 %v1792_v41  ;;  %v1817_v41 = vld [vmem:[%s2952_s2 + $0x98] sm:$0xf0] }
 0x1e4   : > { %v917_v43 = vpop.f32.mrf.mxu0 }
 0x1e5   : > { %v1959_v43 = vld [vmem:[%s2952_s2 + $0x64] sm:$0xf] }
 0x1e6   : > { %v2042_v44 = vpop.eup %2041 }
 0x1e7   : > { %v867_v45 = vpack.c.bf16 %v2042_v44, %v2042_v44  ;;  %v864_v46 = vsel %vm857_vm3, %v2042_v44, 0.0  ;;  %v1793_v44 = vld [vmem:[%s2952_s2 + $0x68] sm:$0xf0] }
 0x1e8   : > { %865 = vadd.xlane.f32.xlu1 %v864_v46  ;;  %v1796_v46 = vor.u32 %v1959_v43, %v1793_v44 }
 0x1e9   : > { %1734 = vmatmul.msk.bf16.vlgmr.msrb.gmra.mxu3 %vm857_vm3, %v867_v45  ;;  %v1975_v45 = vld [vmem:[%s2952_s2 + $0xe4] sm:$0xf] }
 0x1ea   : > { %1299 = vmatpush.bf16.msrb.mxu3 %v1864_v31  ;;  %1313 = vmatpush.bf16.msrb.mxu0 %v1796_v46  ;;  %v1764_v31 = vor.u32 %v1951_v25, %v1761_v26 }
 0x1ec   : > { %v1035_v47 = vpop.f32.mrf.mxu0 }
 0x1ed   : > { %v1039_v48 = vsel %vm827_vm2, %v1035_v47, -inf  ;;  %v1857_v47 = vld [vmem:[%s2952_s2 + $0xe8] sm:$0xf0] }
 0x1ee   : > { %v1040_v49 = vsel %vm857_vm3, %v1039_v48, -inf  ;;  %v1860_v32 = vor.u32 %v1975_v45, %v1857_v47 }
 0x1ef   : > { %1041 = vmax.xlane.f32.xlu0 %v1040_v49  ;;  %v1958_v49 = vld [vmem:[%s2952_s2 + $0x54] sm:$0xf0] }
 0x1f4   : > { %v1037_v50 = vpop.f32.mrf.mxu0 }
 0x1f5   : > { %v1847_v50 = vld [vmem:[%s2952_s2 + $0xd0] sm:$0xf] }
 0x1f7   : > { %933 = vrot.lane.b32.xlu2 %v932_v51, %s2137_s9  ;;  %v1974_v51 = vld [vmem:[%s2952_s2 + $0xd4] sm:$0xf0] }
 0x220   : > { %980 = vmax.xlane.f32.xlu2 %v979_v53 }
 0x252   : > { %v922_v54 = vpop.xlane.xlu2 %921 }
 0x253   : > { %v923_v55 = vsub.f32 %v919_v40, %v922_v54  ;;  %v1976_v40 = vld [vmem:[%s2952_s2 + $0xe4] sm:$0xf0]  ;;  %v1785_v54 = vld [vmem:[%s2952_s2 + $0x58] sm:$0xf0] }
 0x254   : > { %v1856_v42 = vor.u32 %v1976_v40, %v1855_v39  ;;  %v1753_v39 = vld [vmem:[%s2952_s2 + $0x18] sm:$0xf0]  ;;  %v1965_v40 = vld [vmem:[%s2952_s2 + $0x94] sm:$0xf] }
 0x255   : > { %v924_v56 = vmul.f32 1.442695, %v923_v55  ;;  %v1973_v55 = vld [vmem:[%s2952_s2 + $0xd4] sm:$0xf]  ;;  %v1756_v45 = vor.u32 %v1949_v38, %v1753_v39  ;;  %v1820_v46 = vor.u32 %v1965_v40, %v1817_v41 }
 0x256   : > { %1300 = vmatpush.bf16.msrb.mxu3 %v1856_v42  ;;  %v1752_v42 = vor.u32 %v1950_v34, %v1751_v33 }
 0x257   : > { %2043 = vpow2.f32 %v924_v56  ;;  %v1849_v56 = vld [vmem:[%s2952_s2 + $0xd8] sm:$0xf0] }
 0x25a   : > { %v934_v57 = vpop.permute.xlu2 %933 }
 0x25b   : > { %v939_v58 = vsel %vm871_vm1, %v934_v57, 0  ;;  %v1848_v57 = vor.u32 %v1974_v51, %v1847_v50  ;;  %v1964_v51 = vld [vmem:[%s2952_s2 + $0x84] sm:$0xf0] }
 0x25c   : > { %948 = vmatpush.bf16.msra.mxu1 %v939_v58 }
 0x25d   : > { %v2044_v60 = vpop.eup %2043  ;;  %1301 = vmatpush.bf16.msrb.mxu3 %v1848_v57  ;;  %v1809_v57 = vld [vmem:[%s2952_s2 + $0x88] sm:$0xf0] }
 0x25e   : > { %v929_v61 = vpack.c.bf16 %v2044_v60, %v2044_v60  ;;  %v926_v62 = vsel %vm857_vm3, %v2044_v60, 0.0  ;;  %v1956_v60 = vld [vmem:[%s2952_s2 + $0x44] sm:$0xf0] }
 0x25f   : > { %927 = vadd.xlane.f32.xlu0 %v926_v62  ;;  %v1852_v62 = vor.u32 %v1973_v55, %v1849_v56  ;;  %v1963_v56 = vld [vmem:[%s2952_s2 + $0x84] sm:$0xf] }
 0x260   : > { %1068 = vmatpush.bf16.msrb.mxu1 %v1059_v59  ;;  %v1775_v59 = vld [vmem:[%s2952_s2 + $0x40] sm:$0xf] }
 0x261   : > { %1736 = vmatmul.msk.bf16.vlgmr.msra.gmra.mxu1 %vm857_vm3, %v929_v61  ;;  %v1839_v61 = vld [vmem:[%s2952_s2 + $0xc0] sm:$0xf] }
 0x262   : > { %v1042_v63 = vpop.xlane.xlu0 %1041 }
 0x263   : > { %v1043_v0 = vsub.f32 %v1039_v48, %v1042_v63  ;;  %v1783_v48 = vld [vmem:[%s2952_s2 + $0x50] sm:$0xf]  ;;  %v1972_v63 = vld [vmem:[%s2952_s2 + $0xc4] sm:$0xf0] }
 0x264   : > { %1325 = vmatpush.bf16.msra.mxu1 %v1868_v37  ;;  %v1784_v53 = vor.u32 %v1958_v49, %v1783_v48  ;;  %v1966_v37 = vld [vmem:[%s2952_s2 + $0x94] sm:$0xf0]  ;;  %v1743_v48 = vld [vmem:[%s2952_s2] sm:$0xf]  ;;  %v1948_v49 = vld [vmem:[%s2952_s2 + $0x4] sm:$0xf0] }
 0x265   : > { %v1044_v1 = vmul.f32 1.442695, %v1043_v0  ;;  %v1955_v0 = vld [vmem:[%s2952_s2 + $0x44] sm:$0xf]  ;;  %v1816_v44 = vor.u32 %v1966_v37, %v1815_v35  ;;  %v1744_v50 = vor.u32 %v1948_v49, %v1743_v48 }
 0x266   : > { %1288 = vmatpush.bf16.msra.mxu2 %v1784_v53  ;;  %v1745_v53 = vld [vmem:[%s2952_s2 + $0x8] sm:$0xf0] }
 0x267   : > { %2045 = vpow2.f32 %v1044_v1  ;;  %v1777_v1 = vld [vmem:[%s2952_s2 + $0x48] sm:$0xf0] }
 0x268   : > { %1326 = vmatpush.bf16.msra.mxu1 %v1860_v32  ;;  %v1807_v32 = vld [vmem:[%s2952_s2 + $0x80] sm:$0xf] }
 0x26c   : > { %v2707_v2 = vpop.f32.mrf.mxu3  ;;  %1327 = vmatpush.bf16.msra.mxu1 %v1852_v62 }
 0x26d   : > { %v2046_v3 = vpop.eup %2045 }
 0x26e   : > { %v1049_v4 = vpack.c.bf16 %v2046_v3, %v2046_v3  ;;  %v1046_v5 = vsel %vm857_vm3, %v2046_v3, 0.0  ;;  %v1971_v3 = vld [vmem:[%s2952_s2 + $0xc4] sm:$0xf] }
 0x26f   : > { %1047 = vadd.xlane.f32.xlu0 %v1046_v5  ;;  %v1776_v5 = vor.u32 %v1956_v60, %v1775_v59  ;;  %v866_v59 = vpop.xlane.xlu1 %865 }
 0x271   : > { %1740 = vmatmul.msk.bf16.vlgmr.msrb.gmra.mxu1 %vm857_vm3, %v1049_v4  ;;  %v1841_v4 = vld [vmem:[%s2952_s2 + $0xc8] sm:$0xf0]  ;;  %1289 = vmatpush.bf16.msra.mxu2 %v1776_v5 }
 0x274   : > { %v886_v6 = vpop.f32.mrf.mxu3 }
 0x275   : > { %v1840_v6 = vor.u32 %v1972_v63, %v1839_v61 }
 0x277   : > { %1302 = vmatpush.bf16.msrb.mxu3 %v1840_v6 }
 0x293   : > { %v981_v7 = vpop.xlane.xlu2 %980 }
 0x294   : > { %v982_v8 = vsub.f32 %v978_v52, %v981_v7  ;;  %v1957_v52 = vld [vmem:[%s2952_s2 + $0x54] sm:$0xf]  ;;  %v1780_v7 = vor.u32 %v1955_v0, %v1777_v1 }
 0x295   : > { %v1788_v58 = vor.u32 %v1957_v52, %v1785_v54  ;;  %v1947_v52 = vld [vmem:[%s2952_s2 + $0x4] sm:$0xf]  ;;  %v1808_v54 = vor.u32 %v1964_v51, %v1807_v32 }
 0x296   : > { %v983_v9 = vmul.f32 1.442695, %v982_v8  ;;  %v1767_v8 = vld [vmem:[%s2952_s2 + $0x30] sm:$0xf]  ;;  %v1748_v55 = vor.u32 %v1947_v52, %v1745_v53 }
 0x297   : > { %1314 = vmatpush.bf16.msrb.mxu0 %v1788_v58  ;;  %v1812_v58 = vor.u32 %v1963_v56, %v1809_v57 }
 0x298   : > { %2047 = vpow2.f32 %v983_v9  ;;  %v1954_v9 = vld [vmem:[%s2952_s2 + $0x34] sm:$0xf0] }
 0x29b   : > { %1315 = vmatpush.bf16.msrb.mxu0 %v1780_v7 }
 0x29e   : > { %v2048_v10 = vpop.eup %2047 }
 0x29f   : > { %v988_v11 = vpack.c.bf16 %v2048_v10, %v2048_v10  ;;  %v985_v12 = vsel %vm857_vm3, %v2048_v10, 0.0  ;;  %v1831_v10 = vld [vmem:[%s2952_s2 + $0xb0] sm:$0xf] }
 0x2a0   : > { %986 = vadd.xlane.f32.xlu2 %v985_v12  ;;  %v1970_v12 = vld [vmem:[%s2952_s2 + $0xb4] sm:$0xf0] }
 0x2a1   : > { %1738 = vmatmul.msk.bf16.vlgmr.msra.gmra.mxu3 %vm857_vm3, %v988_v11  ;;  %v1844_v11 = vor.u32 %v1971_v3, %v1841_v4 }
 0x2a3   : > { %1328 = vmatpush.bf16.msra.mxu1 %v1844_v11 }
 0x2d2   : > { %v928_v13 = vpop.xlane.xlu0 %927 }
 0x2d3   : > { %2049 = vrcp.f32 %v928_v13  ;;  %v1953_v13 = vld [vmem:[%s2952_s2 + $0x34] sm:$0xf] }
 0x2d9   : > { %v2050_v17 = vpop.eup %2049 }
 0x2de   : > { %v950_v14 = vpop.f32.mrf.mxu1 }
 0x2df   : > { %v955_v20 = vmul.f32 %v2050_v17, %v950_v14  ;;  %v1769_v14 = vld [vmem:[%s2952_s2 + $0x38] sm:$0xf0]  ;;  %v1768_v17 = vor.u32 %v1954_v9, %v1767_v8  ;;  %v1120_v9 = vld [vmem:[%s2953_s3] sm:$0x3] }
 0x2e1   : > { %1290 = vmatpush.bf16.msra.mxu2 %v1768_v17 }
 0x2e2   : > { %v1048_v15 = vpop.xlane.xlu0 %1047 }
 0x2e3   : > { %2051 = vrcp.f32 %v1048_v15  ;;  %v1969_v15 = vld [vmem:[%s2952_s2 + $0xb4] sm:$0xf] }
 0x2e4   : > { %2053 = vrcp.f32 %v866_v59 }
 0x2e6   : > { %v952_v16 = vpop.f32.mrf.mxu1 }
 0x2e7   : > { %v1833_v16 = vld [vmem:[%s2952_s2 + $0xb8] sm:$0xf0] }
 0x2e9   : > { %v2052_v18 = vpop.eup %2051 }
 0x2ea   : > { %v2054_v61 = vpop.eup %2053 }
 0x2eb   : > { %v889_v0 = vmul.f32 %v2054_v61, %v2707_v2  ;;  %v1123_v2 = vperm.slane %v1120_v9, 1 }
 0x2ee   : > { %v1070_v19 = vpop.f32.mrf.mxu1 }
 0x2ef   : > { %v1075_v21 = vmul.f32 %v2052_v18, %v1070_v19  ;;  %v1832_v18 = vor.u32 %v1970_v12, %v1831_v10  ;;  %v1772_v19 = vor.u32 %v1953_v13, %v1769_v14  ;;  %v1122_v13 = vperm.slane %v1120_v9, 0 }
 0x2f1   : > { %v2036_v22 = vpack.i.bf16 %v1075_v21, %v955_v20  ;;  %v1759_v20 = vld [vmem:[%s2952_s2 + $0x20] sm:$0xf]  ;;  %v1952_v21 = vld [vmem:[%s2952_s2 + $0x24] sm:$0xf0]  ;;  %1303 = vmatpush.bf16.msrb.mxu3 %v1832_v18  ;;  %1316 = vmatpush.bf16.msrb.mxu0 %v1772_v19 }
 0x2f2   : > { %v1760_v29 = vor.u32 %v1952_v21, %v1759_v20 }
 0x2f3   : > { %2037 = vrot.lane.b32.xlu0 %v2036_v22, %s2137_s9  ;;  %v1823_v22 = vld [vmem:[%s2952_s2 + $0xa0] sm:$0xf]  ;;  %s2077_s9 = scalar_lea.hbm %s2954_s4, 32 }
 0x2f4   : > { %v1824_v30 = vor.u32 %v1968_v24, %v1823_v22  ;;  %1291 = vmatpush.bf16.msra.mxu2 %v1760_v29  ;;  %p2079_p2 = scmp.lt.s32.totalorder %s2077_s9, %s2073_s5 }
 0x2f5   : > { %1317 = vmatpush.bf16.msrb.mxu0 %v1764_v31 }
 0x2f6   : > { %v1072_v23 = vpop.f32.mrf.mxu1  ;;  %1304 = vmatpush.bf16.msrb.mxu3 %v1824_v30  ;;  %p2080_p3 = por %p2079_p2, %p2078_p1 }
 0x2f7   : > { %v1836_v23 = vor.u32 %v1969_v15, %v1833_v16 }
 0x2f8   : > { %1292 = vmatpush.bf16.msra.mxu2 %v1752_v42  ;;  %p2081_p5 = pnand %p2080_p3, %p2076_p0 }
 0x2f9   : > { %1329 = vmatpush.bf16.msra.mxu1 %v1836_v23  ;;  %1318 = vmatpush.bf16.msrb.mxu0 %v1756_v45 }
 0x2fa   : > { %1305 = vmatpush.bf16.msrb.mxu3 %v1816_v44 }
 0x2fc   : > { %1293 = vmatpush.bf16.msra.mxu2 %v1744_v50 }
 0x2fd   : > { %1330 = vmatpush.bf16.msra.mxu1 %v1828_v36  ;;  %1319 = vmatpush.bf16.msrb.mxu0 %v1748_v55 }
 0x2fe   : > { %1306 = vmatpush.bf16.msrb.mxu3 %v1808_v54 }
 0x301   : > { %1331 = vmatpush.bf16.msra.mxu1 %v1820_v46 }
 0x305   : > { %1332 = vmatpush.bf16.msra.mxu1 %v1812_v58 }
 0x313   : > { %v987_v60 = vpop.xlane.xlu2 %986 }
 0x314   : > { %2055 = vrcp.f32 %v987_v60 }
 0x31a   : > { %v2056_v62 = vpop.eup %2055 }
 0x324   : > { %v1004_v43 = vpop.f32.mrf.mxu3 }
 0x325   : > { %v1009_v1 = vmul.f32 %v2056_v62, %v1004_v43 }
 0x32c   : > { %v1006_v47 = vpop.f32.mrf.mxu3 }
 0x365   : > { %v2038_v63 = vpop.permute.xlu0 %2037 }
 0x366   : > { %v2040_v3 = vunpack.i.h.bf16 %v2038_v63  ;;  %v2039_v4 = vunpack.i.l.bf16 %v2038_v63 }
 0x368   : > { %v1084_v5 = vsel %vm654_vm0, %v889_v0, %v2039_v4  ;;  %v1085_v6 = vsel %vm654_vm0, %v1009_v1, %v2040_v3 }
 0x369   : > { %v1086_v7 = vpack.c.bf16 %v1084_v5, %v1084_v5  ;;  %v1087_v8 = vpack.c.bf16 %v1085_v6, %v1085_v6 }
 0x36b   : > { %1294 = vmatmul.bf16.vlgmr.msra.gmra.mxu2 %v1086_v7  ;;  %1307 = vmatmul.bf16.vlgmr.msrb.gmra.mxu3 %v1087_v8 }
 0x36c   : > { %1320 = vmatmul.bf16.vlgmr.msrb.gmra.mxu0 %v1086_v7  ;;  %1333 = vmatmul.bf16.vlgmr.msra.gmra.mxu1 %v1087_v8 }
 0x3e9   : > { %v1321_v10 = vpop.f32.mrf.mxu0  ;;  %v1334_v11 = vpop.f32.mrf.mxu1 }
 0x3ea   : > { %v1322_v12 = vadd.f32 %v1321_v10, %v1123_v2 }
 0x3ec   : > { %v1335_v14 = vadd.f32 %v1334_v11, %v1322_v12 }
 0x3ee   : > { %v1295_v15 = vpop.f32.mrf.mxu2  ;;  %v1308_v16 = vpop.f32.mrf.mxu3  ;;  %1339 = vst.msk [vmem:[%s204_s26 + $0x8] sm:$0xff] %vm654_vm0, %v1335_v14 }
 0x3ef   : > { %v1296_v17 = vadd.f32 %v1295_v15, %v1122_v13 }
 0x3f1   : > { %v1309_v18 = vadd.f32 %v1308_v16, %v1296_v17  ;;  %v1323_v19 = vpop.f32.mrf.mxu0  ;;  %v1336_v20 = vpop.f32.mrf.mxu1 }
 0x3f3   : > { %1338 = vst [vmem:[%s204_s26] sm:$0xff] %v1309_v18 }
 0x3f4   : > { %2084 = shalt.err (!%p2081_p5)
}
 0x3f5   : > { %1980 = dma.vmem_to_hbm [thread:$0]  (%p2203_p4), %s1357_s29, 256, %s1359_s30, %s1341_s18  }
 0x3f6   : > { %v1297_v21 = vpop.f32.mrf.mxu2  ;;  %v1310_v22 = vpop.f32.mrf.mxu3 }
 0x3f7 PF: > { %p1986_p6 = scmp.ge.s32.totalorder %s2135_s20, 2  ;;  %s1370_s11 = sand.u32 1, %s2115_s15  }
 0x3f8   : > { %s1371_s12 = scalar_lea.sflag [#allocation4], %s1370_s11 }
 0x3f9   : > { %p1983_p7 = pnand %p1986_p6, %p2210_p8 }
 0x3fb   : > { %p1984_p9 = pneg %p1983_p7 }
 0x3fd   : > { %2110 = dma.done.wait (%p1984_p9), %s1371_s12, 256  }
 0x3fe   : > { %2112 = vsyncadd (%p1984_p9), %s1371_s12, 4294967040  ;;  %s17_s20 = sadd.s32 1, %s2135_s20   ;;  %s2957_s15 = smov %s2119_s16 }
 0x3ff   : > { %p14_p10 = scmp.ge.s32.totalorder %s17_s20, 4   ;;  %s2958_s16 = smov %s2123_s17 }
 0x400   : > { %s2959_s17 = smov %s2216_s28  ;;  %s2960_s18 = smov %s2131_s19 }
 0x401   : > { %s2961_s19 = smov %s2963_s23  ;;  %16 = sbr.rel (!%p14_p10) target bundleno = 4 (0x4), region = 76 }
 0x406   :  { %1377 = vsyncpa [#allocation4], 1 }
 0x407   :  { %1379 = vsyncpa [#allocation4 + $0x1], 1 }

</bundles_post_ra>
